<compile_context>
chip_gen: v5e
topology: v5e:2x2
jax: 0.10.0
libtpu: 0.0.40
codegen_flags: <defaults>
</compile_context>

<pallas_src>
import functools

import jax
import jax.numpy as jnp
import numpy as np
from jax.experimental import pallas as pl
from jax.experimental.pallas import tpu as pltpu

OUT_PAD = 128  # lane-dense padded output width (column 0 is the real logit)


def _round_up(x, m):
    return ((x + m - 1) // m) * m


def pin_kernel(x_ref, wemb_ref, bemb_ref,
               w1_ref, b1_ref, w2_ref, b2_ref, w3_ref, b3_ref,
               out_ref, *, num_features):
    F = num_features
    cdt = w1_ref.dtype  # matmul operand dtype (bf16 or f32)

    # --- fused block-diagonal embedding matmul (one MXU launch, f32 acc) ---
    emb = jnp.dot(x_ref[...], wemb_ref[...],
                  preferred_element_type=jnp.float32) + bemb_ref[...]
    uc_emb = emb[:, 0:F]
    bc_emb = emb[:, F:2 * F]
    bcat_emb = emb[:, 2 * F:3 * F]

    # --- pairwise interactions packed densely (96 lanes), ONE tanh push ---
    allv = jnp.tanh(jnp.concatenate(
        [uc_emb * bc_emb, uc_emb * bcat_emb, bc_emb * bcat_emb], axis=-1))

    # --- decoder: single K=96 dot, then Tanh -> Linear -> Tanh -> Linear ---
    h1 = jnp.tanh(jnp.dot(allv.astype(cdt), w1_ref[...],
                          preferred_element_type=jnp.float32) + b1_ref[...])
    h2 = jnp.tanh(jnp.dot(h1.astype(cdt), w2_ref[...],
                          preferred_element_type=jnp.float32) + b2_ref[...])
    x = jnp.dot(h2.astype(cdt), w3_ref[...],
                preferred_element_type=jnp.float32) + b3_ref[...]

    # sigmoid (if any) is applied in the wrapper on the sliced (B, 1) column
    out_ref[...] = x.astype(out_ref.dtype)


def pack_params(params, compute_dtype=jnp.bfloat16):
    """One-time restructuring of the PyTorch-style params for the kernel.

    Call once at param-load time; the result is reused by every forward call
    (no per-call scatter / pad / concat / cast kernels).
    """
    (wuc, buc, wbc, bbc, wbcat, bbcat, w1, b1, w2, b2, w3, b3) = params
    n_uc, F = wuc.shape
    n_bc = wbc.shape[0]
    n_bcat = wbcat.shape[0]
    n_total = n_uc + n_bc + n_bcat
    h1 = w1.shape[1]
    h2 = w2.shape[1]

    # block-diagonal fused embedding weight (n_total, 3F) + fused bias (1, 3F)
    w_emb = jnp.zeros((n_total, 3 * F), jnp.float32)
    w_emb = w_emb.at[0:n_uc, 0:F].set(wuc)
    w_emb = w_emb.at[n_uc:n_uc + n_bc, F:2 * F].set(wbc)
    w_emb = w_emb.at[n_uc + n_bc:n_total, 2 * F:3 * F].set(wbcat)
    b_emb = jnp.concatenate([buc, bbc, bbcat], axis=-1)

    # lane-dense (128-wide) final layer; column 0 carries the real output
    w3_pad = jnp.zeros((h2, OUT_PAD), jnp.float32).at[:, 0:1].set(w3)
    b3_pad = jnp.zeros((1, OUT_PAD), jnp.float32).at[:, 0:1].set(b3)

    packed = {
        # matmul operands in compute_dtype (bf16 -> >=2x MXU rate, f32 acc)
        "w_emb": w_emb.astype(compute_dtype),
        "w1": w1.astype(compute_dtype),
        "w2": w2.astype(compute_dtype),
        "w3": w3_pad.astype(compute_dtype),
        # biases / elementwise path stay f32
        "b_emb": b_emb.astype(jnp.float32),
        "b1": b1.astype(jnp.float32),
        "b2": b2.astype(jnp.float32),
        "b3": b3_pad.astype(jnp.float32),
    }
    meta = {"num_features": F, "n_total": n_total, "h1": h1, "h2": h2,
            "compute_dtype": jnp.dtype(compute_dtype)}
    return packed, meta


def pin_model_forward(uc_feat, bc_feat, bcat_feat, packed, meta,
                      methods="classification", batch_tile=None):
    B = uc_feat.shape[0]
    F = meta["num_features"]
    n_total = meta["n_total"]
    h1 = meta["h1"]
    h2 = meta["h2"]
    cdt = meta["compute_dtype"]

    # --- batch tiling: >=2 grid steps when possible (v7x megacore), cap 1024 ---
    if batch_tile is None:
        half = _round_up(pl.cdiv(_round_up(B, 8), 2), 8)
        batch_tile = min(1024, max(8, half))
    batch_tile = max(8, _round_up(batch_tile, 8))
    B_pad = _round_up(B, batch_tile)
    grid = (B_pad // batch_tile,)

    # one dense feature slab instead of three lane-sparse ones
    # TODO(synk): if the caller can supply the features pre-concatenated, this
    # extra concat (+cast) launch can be skipped entirely.
    x_all = jnp.concatenate([uc_feat, bc_feat, bcat_feat], axis=-1).astype(cdt)
    if B_pad != B:
        x_all = jnp.pad(x_all, ((0, B_pad - B), (0, 0)))

    def full_spec(arr):
        return pl.BlockSpec(arr.shape, lambda i: (0, 0))

    kernel = functools.partial(pin_kernel, num_features=F)

    itemsize = int(jnp.dtype(cdt).itemsize)
    flops = 2 * B_pad * (n_total * 3 * F + 3 * F * h1 + h1 * h2 + h2 * OUT_PAD)
    transcendentals = B_pad * (3 * F + h1 + h2)
    weight_bytes = sum(int(packed[k].size) * int(packed[k].dtype.itemsize)
                       for k in ("w_emb", "b_emb", "w1", "b1",
                                 "w2", "b2", "w3", "b3"))
    bytes_accessed = (int(x_all.size) * itemsize + weight_bytes
                      + B_pad * OUT_PAD * 4)

    out = pl.pallas_call(
        kernel,
        out_shape=jax.ShapeDtypeStruct((B_pad, OUT_PAD), jnp.float32),
        grid=grid,
        in_specs=[
            pl.BlockSpec((batch_tile, n_total), lambda i: (i, 0)),
            full_spec(packed["w_emb"]), full_spec(packed["b_emb"]),
            full_spec(packed["w1"]), full_spec(packed["b1"]),
            full_spec(packed["w2"]), full_spec(packed["b2"]),
            full_spec(packed["w3"]), full_spec(packed["b3"]),
        ],
        out_specs=pl.BlockSpec((batch_tile, OUT_PAD), lambda i: (i, 0)),
        compiler_params=pltpu.CompilerParams(
            dimension_semantics=("parallel",)),
        cost_estimate=pl.CostEstimate(flops=int(flops),
                                      transcendentals=int(transcendentals),
                                      bytes_accessed=int(bytes_accessed)),
    )(x_all,
      packed["w_emb"], packed["b_emb"],
      packed["w1"], packed["b1"],
      packed["w2"], packed["b2"],
      packed["w3"], packed["b3"])

    logits = out[:B, 0:1]
    if methods == "regression":
        return logits
    return jax.nn.sigmoid(logits)   # sigmoid fused into the (B, 1) slice


def reference_forward(uc_feat, bc_feat, bcat_feat, params,
                      methods="classification"):
    (wuc, buc, wbc, bbc, wbcat, bbcat, w1, b1, w2, b2, w3, b3) = params
    uc_emb = uc_feat @ wuc + buc
    bc_emb = bc_feat @ wbc + bbc
    bcat_emb = bcat_feat @ wbcat + bbcat
    allv = jnp.tanh(jnp.concatenate(
        [uc_emb * bc_emb, uc_emb * bcat_emb, bc_emb * bcat_emb], axis=-1))
    h1 = jnp.tanh(allv @ w1 + b1)
    h2 = jnp.tanh(h1 @ w2 + b2)
    x = h2 @ w3 + b3
    return x if methods == "regression" else jax.nn.sigmoid(x)


def init_params(key, n_uc, n_bc, n_bcat, num_features):
    n_dec = 3 * num_features
    h1 = int(round(n_dec / 2, 0))
    h2 = int(round(n_dec / 4, 0))
    ks = jax.random.split(key, 12)
    s = 0.1
    params = (
        s * jax.random.normal(ks[0], (n_uc, num_features), jnp.float32),
        s * jax.random.normal(ks[1], (1, num_features), jnp.float32),
        s * jax.random.normal(ks[2], (n_bc, num_features), jnp.float32),
        s * jax.random.normal(ks[3], (1, num_features), jnp.float32),
        s * jax.random.normal(ks[4], (n_bcat, num_features), jnp.float32),
        s * jax.random.normal(ks[5], (1, num_features), jnp.float32),
        s * jax.random.normal(ks[6], (n_dec, h1), jnp.float32),
        s * jax.random.normal(ks[7], (1, h1), jnp.float32),
        s * jax.random.normal(ks[8], (h1, h2), jnp.float32),
        s * jax.random.normal(ks[9], (1, h2), jnp.float32),
        s * jax.random.normal(ks[10], (h2, 1), jnp.float32),
        s * jax.random.normal(ks[11], (1, 1), jnp.float32),
    )
    return params


if __name__ == "__main__":
    B = 16
    NUM_UC, NUM_BC, NUM_BCAT = 16, 24, 20
    NUM_FEATURES = 32
    METHODS = "classification"   # anything != 'regression' applies sigmoid

    key = jax.random.PRNGKey(0)
    k_uc, k_bc, k_bcat, k_params = jax.random.split(key, 4)

    uc_feat = jax.random.normal(k_uc, (B, NUM_UC), jnp.float32)
    bc_feat = jax.random.normal(k_bc, (B, NUM_BC), jnp.float32)
    bcat_feat = jax.random.normal(k_bcat, (B, NUM_BCAT), jnp.float32)

    params = init_params(k_params, NUM_UC, NUM_BC, NUM_BCAT, NUM_FEATURES)
    ref = reference_forward(uc_feat, bc_feat, bcat_feat, params,
                            methods=METHODS)

    # --- f32 compute path: exact check (default tiling -> 2 grid steps) ---
    packed_f32, meta_f32 = pack_params(params, compute_dtype=jnp.float32)
    out_f32 = pin_model_forward(uc_feat, bc_feat, bcat_feat,
                                packed_f32, meta_f32, methods=METHODS)
    out_f32 = jax.block_until_ready(out_f32)
    np.testing.assert_allclose(np.asarray(out_f32), np.asarray(ref),
                               rtol=1e-4, atol=1e-5)

    # --- bf16 matmul path (production default): relaxed tolerance ---
    packed_bf16, meta_bf16 = pack_params(params, compute_dtype=jnp.bfloat16)
    out_bf16 = pin_model_forward(uc_feat, bc_feat, bcat_feat,
                                 packed_bf16, meta_bf16, methods=METHODS)
    out_bf16 = jax.block_until_ready(out_bf16)
    np.testing.assert_allclose(np.asarray(out_bf16), np.asarray(ref),
                               rtol=2e-2, atol=2e-2)

    # --- also exercise a single-step grid and the padded-batch path ---
    out_single = pin_model_forward(uc_feat, bc_feat, bcat_feat,
                                   packed_bf16, meta_bf16, methods=METHODS,
                                   batch_tile=16)
    out_single = jax.block_until_ready(out_single)
    np.testing.assert_allclose(np.asarray(out_single), np.asarray(ref),
                               rtol=2e-2, atol=2e-2)

    out_padded = pin_model_forward(uc_feat[:13], bc_feat[:13], bcat_feat[:13],
                                   packed_bf16, meta_bf16, methods=METHODS)
    out_padded = jax.block_until_ready(out_padded)
    np.testing.assert_allclose(np.asarray(out_padded), np.asarray(ref[:13]),
                               rtol=2e-2, atol=2e-2)

    print("KERNEL_OK")
</pallas_src>

<mosaic_0001>
module attributes {stable_mosaic.version = 11 : i64} {
  func.func @pin_kernel(%arg0: i32, %arg1: memref<8x60xf32, #tpu.memory_space<vmem>>, %arg2: memref<60x96xf32, #tpu.memory_space<vmem>>, %arg3: memref<1x96xf32, #tpu.memory_space<vmem>>, %arg4: memref<96x48xf32, #tpu.memory_space<vmem>>, %arg5: memref<1x48xf32, #tpu.memory_space<vmem>>, %arg6: memref<48x24xf32, #tpu.memory_space<vmem>>, %arg7: memref<1x24xf32, #tpu.memory_space<vmem>>, %arg8: memref<24x128xf32, #tpu.memory_space<vmem>>, %arg9: memref<1x128xf32, #tpu.memory_space<vmem>>, %arg10: memref<8x128xf32, #tpu.memory_space<vmem>>) attributes {dimension_semantics = [#tpu.dimension_semantics<parallel>], iteration_bounds = array<i64: 2>, scalar_prefetch = 0 : i64, scratch_operands = 0 : i64, tpu.core_type = #tpu.core_type<tc>, window_params = [{transform_indices = @transform_0, window_bounds = array<i64: 8, 60>}, {pipeline_mode = #tpu.pipeline_mode<synchronous>, transform_indices = @transform_1, window_bounds = array<i64: 60, 96>}, {pipeline_mode = #tpu.pipeline_mode<synchronous>, transform_indices = @transform_2, window_bounds = array<i64: 1, 96>}, {pipeline_mode = #tpu.pipeline_mode<synchronous>, transform_indices = @transform_3, window_bounds = array<i64: 96, 48>}, {pipeline_mode = #tpu.pipeline_mode<synchronous>, transform_indices = @transform_4, window_bounds = array<i64: 1, 48>}, {pipeline_mode = #tpu.pipeline_mode<synchronous>, transform_indices = @transform_5, window_bounds = array<i64: 48, 24>}, {pipeline_mode = #tpu.pipeline_mode<synchronous>, transform_indices = @transform_6, window_bounds = array<i64: 1, 24>}, {pipeline_mode = #tpu.pipeline_mode<synchronous>, transform_indices = @transform_7, window_bounds = array<i64: 24, 128>}, {pipeline_mode = #tpu.pipeline_mode<synchronous>, transform_indices = @transform_8, window_bounds = array<i64: 1, 128>}, {transform_indices = @transform_9, window_bounds = array<i64: 8, 128>}]} {
    %c0 = arith.constant 0 : index
    %c0_0 = arith.constant 0 : index
    %0 = vector.load %arg1[%c0, %c0_0] : memref<8x60xf32, #tpu.memory_space<vmem>>, vector<8x60xf32>
    %c0_1 = arith.constant 0 : index
    %c0_2 = arith.constant 0 : index
    %1 = vector.load %arg2[%c0_1, %c0_2] : memref<60x96xf32, #tpu.memory_space<vmem>>, vector<60x96xf32>
    %cst = arith.constant dense<0.000000e+00> : vector<8x96xf32>
    %2 = tpu.matmul %0, %1, %cst {dimension_numbers = #tpu.dot_dimension_numbers<[1], [0], [0], [1], [0, 0, 1, 1], [], []>} : vector<8x60xf32>, vector<60x96xf32>, vector<8x96xf32> -> vector<8x96xf32>
    %c0_3 = arith.constant 0 : index
    %c0_4 = arith.constant 0 : index
    %3 = vector.load %arg3[%c0_3, %c0_4] : memref<1x96xf32, #tpu.memory_space<vmem>>, vector<1x96xf32>
    %4 = vector.broadcast %3 : vector<1x96xf32> to vector<8x96xf32>
    %5 = arith.addf %2, %4 : vector<8x96xf32>
    %6 = vector.extract_strided_slice %5 {offsets = [0, 0], sizes = [8, 32], strides = [1, 1]} : vector<8x96xf32> to vector<8x32xf32>
    %7 = vector.extract_strided_slice %5 {offsets = [0, 32], sizes = [8, 32], strides = [1, 1]} : vector<8x96xf32> to vector<8x32xf32>
    %8 = vector.extract_strided_slice %5 {offsets = [0, 64], sizes = [8, 32], strides = [1, 1]} : vector<8x96xf32> to vector<8x32xf32>
    %9 = arith.mulf %6, %7 : vector<8x32xf32>
    %10 = arith.mulf %6, %8 : vector<8x32xf32>
    %11 = arith.mulf %7, %8 : vector<8x32xf32>
    %12 = tpu.concatenate %9, %10, %11 in 1 : vector<8x32xf32>, vector<8x32xf32>, vector<8x32xf32> -> vector<8x96xf32>
    %13 = math.tanh %12 : vector<8x96xf32>
    %c0_5 = arith.constant 0 : index
    %c0_6 = arith.constant 0 : index
    %14 = vector.load %arg4[%c0_5, %c0_6] : memref<96x48xf32, #tpu.memory_space<vmem>>, vector<96x48xf32>
    %cst_7 = arith.constant dense<0.000000e+00> : vector<8x48xf32>
    %15 = tpu.matmul %13, %14, %cst_7 {dimension_numbers = #tpu.dot_dimension_numbers<[1], [0], [0], [1], [0, 0, 1, 1], [], []>} : vector<8x96xf32>, vector<96x48xf32>, vector<8x48xf32> -> vector<8x48xf32>
    %c0_8 = arith.constant 0 : index
    %c0_9 = arith.constant 0 : index
    %16 = vector.load %arg5[%c0_8, %c0_9] : memref<1x48xf32, #tpu.memory_space<vmem>>, vector<1x48xf32>
    %17 = vector.broadcast %16 : vector<1x48xf32> to vector<8x48xf32>
    %18 = arith.addf %15, %17 : vector<8x48xf32>
    %19 = math.tanh %18 : vector<8x48xf32>
    %c0_10 = arith.constant 0 : index
    %c0_11 = arith.constant 0 : index
    %20 = vector.load %arg6[%c0_10, %c0_11] : memref<48x24xf32, #tpu.memory_space<vmem>>, vector<48x24xf32>
    %cst_12 = arith.constant dense<0.000000e+00> : vector<8x24xf32>
    %21 = tpu.matmul %19, %20, %cst_12 {dimension_numbers = #tpu.dot_dimension_numbers<[1], [0], [0], [1], [0, 0, 1, 1], [], []>} : vector<8x48xf32>, vector<48x24xf32>, vector<8x24xf32> -> vector<8x24xf32>
    %c0_13 = arith.constant 0 : index
    %c0_14 = arith.constant 0 : index
    %22 = vector.load %arg7[%c0_13, %c0_14] : memref<1x24xf32, #tpu.memory_space<vmem>>, vector<1x24xf32>
    %23 = vector.broadcast %22 : vector<1x24xf32> to vector<8x24xf32>
    %24 = arith.addf %21, %23 : vector<8x24xf32>
    %25 = math.tanh %24 : vector<8x24xf32>
    %c0_15 = arith.constant 0 : index
    %c0_16 = arith.constant 0 : index
    %26 = vector.load %arg8[%c0_15, %c0_16] : memref<24x128xf32, #tpu.memory_space<vmem>>, vector<24x128xf32>
    %cst_17 = arith.constant dense<0.000000e+00> : vector<8x128xf32>
    %27 = tpu.matmul %25, %26, %cst_17 {dimension_numbers = #tpu.dot_dimension_numbers<[1], [0], [0], [1], [0, 0, 1, 1], [], []>} : vector<8x24xf32>, vector<24x128xf32>, vector<8x128xf32> -> vector<8x128xf32>
    %c0_18 = arith.constant 0 : index
    %c0_19 = arith.constant 0 : index
    %28 = vector.load %arg9[%c0_18, %c0_19] : memref<1x128xf32, #tpu.memory_space<vmem>>, vector<1x128xf32>
    %29 = vector.broadcast %28 : vector<1x128xf32> to vector<8x128xf32>
    %30 = arith.addf %27, %29 : vector<8x128xf32>
    %c0_20 = arith.constant 0 : index
    %c0_21 = arith.constant 0 : index
    %31 = vector.load %arg10[%c0_20, %c0_21] : memref<8x128xf32, #tpu.memory_space<vmem>>, vector<8x128xf32>
    tpu.vector_store %arg10[%c0_20, %c0_21], %30 {strides = array<i32>} : memref<8x128xf32, #tpu.memory_space<vmem>>, vector<8x128xf32>,
    return
  }
  func.func @transform_0(%arg0: i32) -> (i32, i32) {
    %c0_i32 = arith.constant 0 : i32
    %c0_i32_0 = arith.constant 0 : i32
    return %arg0, %c0_i32 : i32, i32
  }
  func.func @transform_1(%arg0: i32) -> (i32, i32) {
    %c0_i32 = arith.constant 0 : i32
    %c0_i32_0 = arith.constant 0 : i32
    %c0_i32_1 = arith.constant 0 : i32
    return %c0_i32, %c0_i32_0 : i32, i32
  }
  func.func @transform_2(%arg0: i32) -> (i32, i32) {
    %c0_i32 = arith.constant 0 : i32
    %c0_i32_0 = arith.constant 0 : i32
    %c0_i32_1 = arith.constant 0 : i32
    return %c0_i32, %c0_i32_0 : i32, i32
  }
  func.func @transform_3(%arg0: i32) -> (i32, i32) {
    %c0_i32 = arith.constant 0 : i32
    %c0_i32_0 = arith.constant 0 : i32
    %c0_i32_1 = arith.constant 0 : i32
    return %c0_i32, %c0_i32_0 : i32, i32
  }
  func.func @transform_4(%arg0: i32) -> (i32, i32) {
    %c0_i32 = arith.constant 0 : i32
    %c0_i32_0 = arith.constant 0 : i32
    %c0_i32_1 = arith.constant 0 : i32
    return %c0_i32, %c0_i32_0 : i32, i32
  }
  func.func @transform_5(%arg0: i32) -> (i32, i32) {
    %c0_i32 = arith.constant 0 : i32
    %c0_i32_0 = arith.constant 0 : i32
    %c0_i32_1 = arith.constant 0 : i32
    return %c0_i32, %c0_i32_0 : i32, i32
  }
  func.func @transform_6(%arg0: i32) -> (i32, i32) {
    %c0_i32 = arith.constant 0 : i32
    %c0_i32_0 = arith.constant 0 : i32
    %c0_i32_1 = arith.constant 0 : i32
    return %c0_i32, %c0_i32_0 : i32, i32
  }
  func.func @transform_7(%arg0: i32) -> (i32, i32) {
    %c0_i32 = arith.constant 0 : i32
    %c0_i32_0 = arith.constant 0 : i32
    %c0_i32_1 = arith.constant 0 : i32
    return %c0_i32, %c0_i32_0 : i32, i32
  }
  func.func @transform_8(%arg0: i32) -> (i32, i32) {
    %c0_i32 = arith.constant 0 : i32
    %c0_i32_0 = arith.constant 0 : i32
    %c0_i32_1 = arith.constant 0 : i32
    return %c0_i32, %c0_i32_0 : i32, i32
  }
  func.func @transform_9(%arg0: i32) -> (i32, i32) {
    %c0_i32 = arith.constant 0 : i32
    %c0_i32_0 = arith.constant 0 : i32
    return %arg0, %c0_i32 : i32, i32
  }
}

</mosaic_0001>

<bundles_post_ra>
// kernel: tpu_custom_call.1
= control target key start
LH: loop header
LB: loop body
LE: loop exit
PB: predicated region body
PF: predicated region fallthrough
CT: control target
= control target key end

     0   :  { %14 = vsyncpa [#allocation3], 0  ;;  %s942_s0 = inlined_call_operand.vmem [shape: f32[16,60], index: 0, kind: input, shape index: {}]   ;;  %s943_s1 = inlined_call_operand.vmem [shape: f32[60,96], index: 1, kind: input, shape index: {}]   ;;  %s944_s2 = inlined_call_operand.vmem [shape: f32[1,96], index: 2, kind: input, shape index: {}]   ;;  %s945_s3 = inlined_call_operand.vmem [shape: f32[96,48], index: 3, kind: input, shape index: {}]   ;;  %s946_s4 = inlined_call_operand.vmem [shape: f32[1,48], index: 4, kind: input, shape index: {}]   ;;  %s947_s5 = inlined_call_operand.vmem [shape: f32[48,24], index: 5, kind: input, shape index: {}]   ;;  %s948_s6 = inlined_call_operand.vmem [shape: f32[1,24], index: 6, kind: input, shape index: {}]   ;;  %s949_s7 = inlined_call_operand.vmem [shape: f32[24,128], index: 7, kind: input, shape index: {}]   ;;  %s950_s8 = inlined_call_operand.vmem [shape: f32[1,128], index: 8, kind: input, shape index: {}]   ;;  %s951_s9 = inlined_call_operand.hbm [shape: f32[16,128], index: 9, kind: output, shape index: {}]  }
   0x1   :  { %16 = vsyncpa [#allocation3 + $0x1], 0  ;;  %s758_s30 = smov 0   ;;  %s760_s10 = smov 0  }
   0x2   :  { %s762_s11 = smov 0   ;;  %s764_s12 = smov 0  }
   0x3 LB: > { %s779_s13 = sadd.s32 4294967295, %s703_s12   ;;  %s574_s14 = sadd.s32 4294967294, %s703_s12   ;;  %s703_s12 = sphi %s764_s12, %s959_s12   ;;  %s699_s11 = sphi %s762_s11, %s958_s11   ;;  %s695_s10 = sphi %s760_s10, %s957_s10   ;;  %s691_s30 = sphi %s758_s30, %s956_s30  }
   0x4   : > { %s783_s15 = sadd.s32 1, %s703_s12   ;;  %s223_s16 = sadd.s32 1, %s699_s11 }
   0x5   : > { %s220_s17 = ssub.s32 %s703_s12, %s783_s15  ;;  %p233_p0 = scmp.ne.s32.totalorder %s699_s11, %s695_s10 }
   0x6   : > { %p221_p1 = scmp.eq.s32.totalorder %s220_s17, 0  ;;  %p234_p2 = scmp.eq.s32.totalorder %s779_s13, 1 }
   0x7   : > { %p239_p3 = scmp.ne.s32.totalorder %s695_s10, %s691_s30  ;;  %p240_p4 = scmp.eq.s32.totalorder %s574_s14, 1 }
   0x8   : > { %s794_s18 = scalar_select %p221_p1, %s699_s11, %s223_s16  }
   0x9   : > { %p796_p5 = por %p234_p2, %p233_p0  ;;  %p800_p6 = por %p240_p4, %p239_p3 }
   0xa   : > { %952 = sst [smem:[#allocation5_spill]] %s794_s18  ;;  %p577_p7 = scmp.ge.s32.totalorder %s703_s12, 1 }
   0xb   : > { %p289_p8 = scmp.lt.s32.totalorder %s703_s12, 3 }
   0xd   : > { %p290_p9 = pnand %p577_p7, %p289_p8 }
   0xe   : > { %p324_p10 = scmp.lt.s32.totalorder (!%p290_p9), %s779_s13, 1  ;;  %s705_s16 = smov (!%p290_p9), 64  }
   0xf   : > { %293 = sbr.rel (%p290_p9) target bundleno = 825 (0x339), region = 56  ;;  %s706_s21 = smov (!%p290_p9), 96  }
  0x10   : > { %s707_s29 = smov (!%p290_p9), 32   ;;  %s586_s14 = sshll.u32 (!%p290_p9), %s779_s13, 3 }
  0x14   : > { %v336_v0 = vld [vmem:[%s943_s1 + $0x38] sm:$0xf]  ;;  %vm345_vm0 = vcmask 1043456   ;;  %v335_v1 = vld [vmem:[%s943_s1 + $0x30] sm:$0xff]  ;;  %v334_v2 = vld [vmem:[%s943_s1 + $0x28] sm:$0xff]  ;;  %s325_s27 = scalar_select %p324_p10, %s779_s13, 1 }
  0x15   : > { %580 = vmatpush.msk.msra.mxu0 %vm345_vm0, %v336_v0  ;;  %v333_v3 = vld [vmem:[%s943_s1 + $0x20] sm:$0xff]  ;;  %v332_v4 = vld [vmem:[%s943_s1 + $0x18] sm:$0xff]  ;;  %v331_v5 = vld [vmem:[%s943_s1 + $0x10] sm:$0xff]  ;;  %vm341_vm1 = vcmask 490496   ;;  %vm386_vm2 = vcmask 261120   ;;  %vm388_vm3 = vcmask 523264  }
  0x16   : > { %s579_s17 = sshll.u32 %s325_s27, 3  ;;  %v330_v6 = vld [vmem:[%s943_s1 + $0x8] sm:$0xff]  ;;  %v329_v7 = vld [vmem:[%s943_s1] sm:$0xff]  ;;  %v402_v12 = vld [vmem:[%s945_s3 + $0x58] sm:$0xff]  ;;  %vm407_vm4 = vcmask 785408   ;;  %vm442_vm5 = vcmask 392192  }
  0x17   : > { %358 = vmatpush.msra.mxu0 %v335_v1  ;;  %s327_s28 = scalar_lea.vmem %s942_s0, %s579_s17  ;;  %v631_v9 = vld [vmem:[%s944_s2] ss:$0 sm:$0xff]  ;;  %v401_v13 = vld [vmem:[%s945_s3 + $0x50] sm:$0xff]  ;;  %415 = vmatpush.msra.mxu1 %v402_v12  ;;  %v400_v14 = vld [vmem:[%s945_s3 + $0x48] sm:$0xff]  ;;  %vm474_vm6 = vcmask 195584   ;;  %s510_s17 = scalar_lea.hbm %s951_s9, %s586_s14 }
  0x18   : > { %v328_v8 = vld [vmem:[%s327_s28] sm:$0xff]  ;;  %v398_v20 = vld [vmem:[%s945_s3 + $0x38] sm:$0xff]  ;;  %v397_v21 = vld [vmem:[%s945_s3 + $0x30] sm:$0xff]  ;;  %s514_s25 = sshll.u32 %s510_s17, 4  ;;  %s515_s25 = int_to_ptr.hbm [resolvable:$true] %s514_s25 }
  0x19   : > { %359 = vmatpush.msra.mxu0 %v334_v2  ;;  %416 = vmatpush.msra.mxu1 %v401_v13  ;;  %v399_v15 = vld [vmem:[%s945_s3 + $0x40] sm:$0xff]  ;;  %v396_v22 = vld [vmem:[%s945_s3 + $0x28] sm:$0xff]  ;;  %v394_v24 = vld [vmem:[%s945_s3 + $0x18] sm:$0xff]  ;;  %s655_s28 = sshra.s32 %s515_s25, 4  ;;  %s656_s28 = int_to_ptr.hbm [resolvable:$true] %s655_s28 }
  0x1a   : > { %v395_v23 = vld [vmem:[%s945_s3 + $0x20] sm:$0xff]  ;;  %v393_v25 = vld [vmem:[%s945_s3 + $0x10] sm:$0xff]  ;;  %v392_v26 = vld [vmem:[%s945_s3 + $0x8] sm:$0xff]  ;;  %s657_s13 = scalar_lea.hbm %s656_s28, 8  ;;  %p662_p0 = scmp.lt.s32.totalorder %s656_s28, %s951_s9 }
  0x1b   : > { %360 = vmatpush.msra.mxu0 %v333_v3  ;;  %417 = vmatpush.msra.mxu1 %v400_v14  ;;  %v391_v27 = vld [vmem:[%s945_s3] sm:$0xff]  ;;  %v437_v28 = vld [vmem:[%s947_s5 + $0x28] sm:$0xff]  ;;  %v435_v35 = vld [vmem:[%s947_s5 + $0x18] sm:$0xff]  ;;  %p658_p11 = scmp.ne.s32.totalorder %s656_s28, %s657_s13 }
  0x1c   : > { %456 = vmatpush.msra.mxu2 %v437_v28  ;;  %v436_v34 = vld [vmem:[%s947_s5 + $0x20] sm:$0xff]  ;;  %v434_v36 = vld [vmem:[%s947_s5 + $0x10] sm:$0xff]  ;;  %v433_v37 = vld [vmem:[%s947_s5 + $0x8] sm:$0xff] }
  0x1d   : > { %361 = vmatpush.msra.mxu0 %v332_v4  ;;  %418 = vmatpush.msra.mxu1 %v399_v15  ;;  %v432_v38 = vld [vmem:[%s947_s5] sm:$0xff]  ;;  %v469_v43 = vld [vmem:[%s949_s7 + $0x10] sm:$0xff]  ;;  %v468_v44 = vld [vmem:[%s949_s7 + $0x8] sm:$0xff]  ;;  %p659_p12 = pnand %p658_p11, %p796_p5 }
  0x1e   : > { %457 = vmatpush.msra.mxu2 %v436_v34  ;;  %v632_v39 = vld [vmem:[%s946_s4] ss:$0 sm:$0xff]  ;;  %491 = vmatpush.msra.mxu3 %v469_v43 }
  0x1f   : > { %362 = vmatpush.msra.mxu0 %v331_v5  ;;  %419 = vmatpush.msra.mxu1 %v398_v20  ;;  %v467_v45 = vld [vmem:[%s949_s7] sm:$0xff]  ;;  %p660_p13 = pneg %p659_p12 }
  0x20   : > { %458 = vmatpush.msra.mxu2 %v435_v35  ;;  %492 = vmatpush.msra.mxu3 %v468_v44  ;;  %v633_v46 = vld [vmem:[%s948_s6] ss:$0 sm:$0xff] }
  0x21   : > { %363 = vmatpush.msra.mxu0 %v330_v6  ;;  %420 = vmatpush.msra.mxu1 %v397_v21  ;;  %v634_v50 = vld [vmem:[%s950_s8] ss:$0 sm:$0xff] }
  0x22   : > { %459 = vmatpush.msra.mxu2 %v434_v36  ;;  %493 = vmatpush.msra.mxu3 %v467_v45 }
  0x23   : > { %364 = vmatpush.msra.mxu0 %v329_v7  ;;  %421 = vmatpush.msra.mxu1 %v396_v22 }
  0x24   : > { %581 = vmatmul.msk.f32.vlgmr.msra.gmra.mxu0 %vm341_vm1, %v328_v8  ;;  %460 = vmatpush.msra.mxu2 %v433_v37 }
  0x25   : > { %422 = vmatpush.msra.mxu1 %v395_v23 }
  0x26   : > { %461 = vmatpush.msra.mxu2 %v432_v38 }
  0x27   : > { %423 = vmatpush.msra.mxu1 %v394_v24 }
  0x29   : > { %424 = vmatpush.msra.mxu1 %v393_v25 }
  0x2b   : > { %425 = vmatpush.msra.mxu1 %v392_v26 }
  0x2d   : > { %426 = vmatpush.msra.mxu1 %v391_v27 }
  0xa1   : > { %v366_v10 = vpop.f32.mrf.mxu0 }
  0xa2   : > { %v367_v11 = vadd.f32 %v631_v9, %v366_v10 }
  0xa4   : > { %374 = vrot.lane.b32.xlu0 %v367_v11, %s705_s16 }
  0xac   : > { %370 = vrot.lane.b32.xlu0 %v367_v11, %s706_s21  ;;  %s661_s21 = scalar_lea.hbm %s951_s9, 16 }
  0xad   : > { %p663_p1 = scmp.lt.s32.totalorder %s661_s21, %s657_s13 }
  0xaf   : > { %p664_p2 = por %p663_p1, %p662_p0 }
  0xb1   : > { %p665_p3 = pnand %p664_p2, %p660_p13 }
 0x116   : > { %v375_v16 = vpop.permute.xlu0 %374 }
 0x117   : > { %v377_v17 = vmul.f32 %v375_v16, %v367_v11 }
 0x119   : > { %379 = vrot.lane.b32.xlu1 %v377_v17, %s707_s29 }
 0x11e   : > { %v371_v18 = vpop.permute.xlu0 %370 }
 0x11f   : > { %v373_v19 = vmul.f32 %v371_v18, %v367_v11 }
 0x121   : > { %383 = vrot.lane.b32.xlu1 %v373_v19, %s707_s29  ;;  %s321_s29 = sand.u32 1, %s695_s10  }
 0x122   : > { %s578_s27 = sshll.u32 %s321_s29, 3  ;;  %s500_s26 = scalar_lea.sflag [#allocation3], %s321_s29 }
 0x123   : > { %s323_s23 = scalar_lea.vmem [#allocation2], %s578_s27 }
 0x124   : > { %s512_s24 = sshll.u32 %s323_s23, 4  ;;  %s513_s24 = int_to_ptr.vmem [resolvable:$true] %s512_s24 }
 0x18b   : > { %v380_v29 = vpop.permute.xlu1 %379 }
 0x18c   : > { %v387_v30 = vsel %vm386_vm2, %v373_v19, %v380_v29 }
 0x193   : > { %v384_v31 = vpop.permute.xlu1 %383 }
 0x194   : > { %v389_v32 = vsel %vm388_vm3, %v387_v30, %v384_v31 }
 0x195   : > { %635 = vtanh.f32 %v389_v32 }
 0x19b   : > { %v636_v33 = vpop.eup %635 }
 0x19c   : > { %582 = vmatmul.msk.f32.vlgmr.msra.gmra.mxu1 %vm407_vm4, %v636_v33 }
 0x219   : > { %v428_v40 = vpop.f32.mrf.mxu1 }
 0x21a   : > { %v429_v41 = vadd.f32 %v632_v39, %v428_v40 }
 0x21c   : > { %637 = vtanh.f32 %v429_v41 }
 0x222   : > { %v638_v42 = vpop.eup %637 }
 0x223   : > { %583 = vmatmul.msk.f32.vlgmr.msra.gmra.mxu2 %vm442_vm5, %v638_v42 }
 0x2a6   : > { %v463_v47 = vpop.f32.mrf.mxu2 }
 0x2a7   : > { %v464_v48 = vadd.f32 %v633_v46, %v463_v47 }
 0x2a9   : > { %639 = vtanh.f32 %v464_v48 }
 0x2af   : > { %v640_v49 = vpop.eup %639 }
 0x2b0   : > { %584 = vmatmul.msk.f32.vlgmr.msra.gmra.mxu3 %vm474_vm6, %v640_v49 }
 0x333   : > { %v495_v51 = vpop.f32.mrf.mxu3 }
 0x334   : > { %v496_v52 = vadd.f32 %v634_v50, %v495_v51 }
 0x336   : > { %498 = vst [vmem:[%s323_s23] sm:$0xff] %v496_v52 }
 0x337   : > { %668 = shalt.err (!%p665_p3)
}
 0x338   : > { %589 = dma.vmem_to_hbm [thread:$0]  (%p796_p5), %s513_s24, 128, %s515_s25, %s500_s26  }
 0x339 PF: > { %p595_p4 = scmp.ge.s32.totalorder %s703_s12, 2  ;;  %s526_s29 = sand.u32 1, %s691_s30  }
 0x33a   : > { %s527_s17 = scalar_lea.sflag [#allocation3], %s526_s29 }
 0x33b   : > { %p592_p7 = pnand %p595_p4, %p800_p6 }
 0x33d   : > { %p593_p8 = pneg %p592_p7 }
 0x33f   : > { %686 = dma.done.wait (%p593_p8), %s527_s17, 128  }
 0x340   : > { %688 = vsyncadd (%p593_p8), %s527_s17, 4294967168  ;;  %s955_s18 = sld [smem:[#allocation5_spill]]  ;;  %p19_p9 = scmp.ge.s32.totalorder %s783_s15, 4  }
 0x341   : > { %s956_s30 = smov %s695_s10  ;;  %s957_s10 = smov %s699_s11 }
 0x342   : > { %s959_s12 = smov %s783_s15  ;;  %21 = sbr.rel (!%p19_p9) target bundleno = 3 (0x3), region = 91 }
 0x346   : > { %s958_s11 = smov %s955_s18 }
 0x347   :  { %533 = vsyncpa [#allocation3], 1 }
 0x348   :  { %535 = vsyncpa [#allocation3 + $0x1], 1 }

</bundles_post_ra>
